<compile_context>
chip_gen: v6e
topology: v6e:2x2x1
jax: 0.10.0
libtpu: 0.0.40
codegen_flags: <defaults>
</compile_context>

<pallas_src>
from collections import namedtuple

import jax
import jax.numpy as jnp
from jax.experimental import pallas as pl
from jax.experimental.pallas import tpu as pltpu


# ----------------------------------------------------------------------------
# Pallas kernel: one batch tile [TB, T, H] -> lane-dense pred / BCE-term rows.
# ----------------------------------------------------------------------------
def coref_kernel(enc_ref, span1_ref, span2_ref,
                 wproj_ref, w1a_ref, w1b_ref,
                 vecs_ref, label_ref,
                 pred_ref, bce_ref):
    f32 = jnp.float32

    # enc tile streamed in its HBM dtype (bf16 preferred); upcast once and do
    # all arithmetic in f32 (v5e has no bf16 VPU/EUP).
    enc = enc_ref[...].astype(f32)                       # [TB, T, H] single read
    tb, t, _ = enc.shape

    pos = jax.lax.broadcasted_iota(jnp.int32, (tb, t), 1)

    def span_weights(span_ref):
        idx = span_ref[...]                              # [TB, 2] int32
        start, end = idx[:, 0:1], idx[:, 1:2]            # [TB, 1]
        m = ((pos >= start) & (pos <= end)).astype(f32)  # [TB, T]
        inv_len = 1.0 / jnp.maximum(jnp.sum(m, axis=-1, keepdims=True), 1.0)
        return m * inv_len                               # rows sum to 1 over span

    wa = span_weights(span1_ref)
    wb = span_weights(span2_ref)

    # Fused span pooling: the (large) enc tile is loaded once above and feeds
    # both masked averages in one traversal of the expression graph.
    pooled1 = jnp.sum(enc * wa[:, :, None], axis=1)      # [TB, H]
    pooled2 = jnp.sum(enc * wb[:, :, None], axis=1)      # [TB, H]

    # pool-then-project (Linear commutes with the span mean); bias hoisted.
    bproj = vecs_ref[0:1, :]
    s1 = jnp.dot(pooled1, wproj_ref[...], preferred_element_type=f32) + bproj
    s2 = jnp.dot(pooled2, wproj_ref[...], preferred_element_type=f32) + bproj

    # label_net Linear(2D, D) without a lane concat:
    #   concat([s1, s2], -1) @ W1 == s1 @ W1_top + s2 @ W1_bot
    b1 = vecs_ref[1:2, :]
    h = jnp.tanh(jnp.dot(s1, w1a_ref[...], preferred_element_type=f32)
                 + jnp.dot(s2, w1b_ref[...], preferred_element_type=f32) + b1)

    # LayerNorm(D), eps=1e-5 (no lane padding -> plain mean/var over D).
    gamma, beta = vecs_ref[2:3, :], vecs_ref[3:4, :]
    mean = jnp.mean(h, axis=-1, keepdims=True)
    c = h - mean
    var = jnp.mean(c * c, axis=-1, keepdims=True)
    hn = c * jax.lax.rsqrt(var + 1e-5) * gamma + beta

    # Dropout(0.2) -> identity (eval mode).

    # Linear(D, 1) + Sigmoid, computed directly as a lane-dense [1, TB] row:
    # logits_row = w2_row . hn^T  (contract D on both sides; avoids relayout).
    w2row = vecs_ref[4:5, :]                             # [1, D]
    b2 = vecs_ref[5:6, 0:1]                              # [1, 1] scalar slot
    logits = jax.lax.dot_general(w2row, hn, (((1,), (1,)), ((), ())),
                                 preferred_element_type=f32) + b2   # [1, TB]
    pred = jax.nn.sigmoid(logits)

    # Per-row BCE term; the mean over the true batch is finished in the wrapper.
    y = label_ref[0]                                     # [1, TB]
    p = jnp.clip(pred, 1e-7, 1.0 - 1e-7)
    bce = -(y * jnp.log(p) + (1.0 - y) * jnp.log(1.0 - p))

    pred_ref[...] = pred[None]                           # [1, 1, TB] lane-dense store
    bce_ref[...] = bce[None]


# ----------------------------------------------------------------------------
# Wrapper: derive the batch tile from VMEM, set up the grid, finish the loss.
# ----------------------------------------------------------------------------
def _pick_batch_tile(B, T, H, enc_itemsize, vmem_budget_bytes, max_tile=256):
    """Largest power-of-two batch tile (>=8, multiple of 8) whose double-buffered
    enc tile fits the VMEM budget, while keeping >=2 grid tiles when possible so
    v7x's two TensorCores both get work."""
    tb = max_tile
    while tb > 8 and 2 * tb * T * H * enc_itemsize > vmem_budget_bytes:
        tb //= 2
    while tb > 8 and -(-B // tb) < 2:
        tb //= 2
    return max(tb, 8)


def coref_forward(enc, span1, span2, params, labels, *, batch_tile=None):
    """enc: [B,T,H] encoder states (bf16 preferred; streamed as-is, no wrapper
    copy when B divides the tile), span1/span2: [B,2] int, labels: [B].
    Returns (BCE loss, pred[B]) matching CorefModel.forward in eval mode.
    batch_tile (if given) must be a multiple of 8."""
    B, T, H = enc.shape
    D = params['wproj'].shape[1]
    f32 = jnp.float32
    enc_itemsize = jnp.dtype(enc.dtype).itemsize

    # Size the tile from this chip's VMEM (128 MiB v5e/v6e, 64 MiB v7x).
    try:
        vmem_cap = int(pltpu.get_tpu_info().vmem_capacity_bytes)
    except Exception:
        vmem_cap = 64 << 20
    vmem_budget = max(16 << 20, int(vmem_cap * 0.55))
    if batch_tile is None:
        batch_tile = _pick_batch_tile(B, T, H, enc_itemsize, vmem_budget)
    TB = batch_tile
    num_tiles = -(-B // TB)
    Bp = num_tiles * TB

    span1 = span1.astype(jnp.int32)
    span2 = span2.astype(jnp.int32)
    labels = labels.astype(f32)
    if Bp != B:
        # Only the batch remainder is padded (no full-tensor H/D pad/copy).
        pad = Bp - B
        enc = jnp.concatenate([enc, jnp.zeros((pad, T, H), enc.dtype)], axis=0)
        span1 = jnp.concatenate([span1, jnp.zeros((pad, 2), jnp.int32)], axis=0)
        span2 = jnp.concatenate([span2, jnp.zeros((pad, 2), jnp.int32)], axis=0)
        labels = jnp.concatenate([labels, jnp.zeros((pad,), f32)], axis=0)
    labels3 = labels.reshape(num_tiles, 1, TB)

    wproj = params['wproj'].astype(f32)                  # [H, D]
    w1a = params['w1'][:D].astype(f32)                   # [D, D]  (top half)
    w1b = params['w1'][D:].astype(f32)                   # [D, D]  (bottom half)
    # Pack all length-D vectors plus the b2 scalar into one (8, D) block:
    # one DMA / one padded vreg tile instead of six tiny blocks.
    vecs = jnp.zeros((8, D), f32)
    vecs = vecs.at[0].set(params['bproj'].astype(f32))
    vecs = vecs.at[1].set(params['b1'].astype(f32))
    vecs = vecs.at[2].set(params['gamma'].astype(f32))
    vecs = vecs.at[3].set(params['beta'].astype(f32))
    vecs = vecs.at[4].set(params['w2'][:, 0].astype(f32))
    vecs = vecs.at[5, 0].set(params['b2'][0].astype(f32))

    # Explicit scoped-VMEM limit: double-buffered enc tile + weights + headroom.
    enc_tile_bytes = TB * T * H * enc_itemsize
    weight_bytes = (H * D + 2 * D * D + 8 * D) * 4
    vmem_limit = int(min(max(int(2.2 * enc_tile_bytes) + 2 * weight_bytes + (8 << 20),
                             32 << 20), 96 << 20))

    def rep(shape):
        return pl.BlockSpec(shape, lambda i: (0, 0))

    grid_spec = pltpu.PrefetchScalarGridSpec(
        num_scalar_prefetch=0,
        grid=(num_tiles,),
        in_specs=[
            pl.BlockSpec((TB, T, H), lambda i: (i, 0, 0)),   # enc tile (bf16 ok)
            pl.BlockSpec((TB, 2), lambda i: (i, 0)),         # span1
            pl.BlockSpec((TB, 2), lambda i: (i, 0)),         # span2
            rep((H, D)),                                     # wproj
            rep((D, D)),                                     # w1 top half
            rep((D, D)),                                     # w1 bottom half
            rep((8, D)),                                     # bproj/b1/gamma/beta/w2/b2
            pl.BlockSpec((1, 1, TB), lambda i: (i, 0, 0)),   # labels (lane-dense)
        ],
        out_specs=(pl.BlockSpec((1, 1, TB), lambda i: (i, 0, 0)),
                   pl.BlockSpec((1, 1, TB), lambda i: (i, 0, 0))),
    )

    pred_p, bce_p = pl.pallas_call(
        coref_kernel,
        out_shape=(jax.ShapeDtypeStruct((num_tiles, 1, TB), f32),
                   jax.ShapeDtypeStruct((num_tiles, 1, TB), f32)),
        grid_spec=grid_spec,
        compiler_params=pltpu.CompilerParams(
            dimension_semantics=("parallel",),
            vmem_limit_bytes=vmem_limit),
    )(enc, span1, span2, wproj, w1a, w1b, vecs, labels3)

    pred = pred_p.reshape(Bp)[:B]
    loss = jnp.sum(bce_p.reshape(Bp)[:B]) / B            # BCE mean over true batch
    return loss, pred


# ----------------------------------------------------------------------------
# Pure-JAX reference (mirrors the PyTorch forward in eval mode).
# ----------------------------------------------------------------------------
def coref_reference(enc, span1, span2, params, labels):
    enc = enc.astype(jnp.float32)
    proj = jnp.einsum('bth,hd->btd', enc, params['wproj']) + params['bproj']
    B, T, _ = enc.shape
    pos = jnp.arange(T)[None, :]

    def span_avg(idx):
        start, end = idx[:, 0:1], idx[:, 1:2]
        mask = ((pos >= start) & (pos <= end)).astype(jnp.float32)
        length = jnp.maximum(mask.sum(1, keepdims=True), 1.0)
        return (proj * mask[:, :, None]).sum(1) / length

    s1, s2 = span_avg(span1), span_avg(span2)
    x = jnp.concatenate([s1, s2], axis=-1)
    h = jnp.tanh(x @ params['w1'] + params['b1'])
    mean = h.mean(-1, keepdims=True)
    var = ((h - mean) ** 2).mean(-1, keepdims=True)
    hn = (h - mean) / jnp.sqrt(var + 1e-5) * params['gamma'] + params['beta']
    pred = jax.nn.sigmoid(hn @ params['w2'] + params['b2'])[:, 0]
    y = labels.astype(jnp.float32)
    p = jnp.clip(pred, 1e-7, 1 - 1e-7)
    loss = -jnp.mean(y * jnp.log(p) + (1 - y) * jnp.log(1 - p))
    return loss, pred


# ----------------------------------------------------------------------------
if __name__ == "__main__":
    # Small shapes consistent with the module; B spans 2 batch tiles -> grid=(2,).
    B, T, H, D, V = 16, 8, 32, 32, 50   # batch, seq, encoder hidden, span_dim, vocab

    key = jax.random.PRNGKey(0)
    keys = jax.random.split(key, 12)

    params = {
        'emb':   jax.random.normal(keys[0], (V, H), jnp.float32) * 0.02,
        'wproj': jax.random.normal(keys[1], (H, D), jnp.float32) * 0.02,
        'bproj': jax.random.normal(keys[2], (D,), jnp.float32) * 0.02,
        'w1':    jax.random.normal(keys[3], (2 * D, D), jnp.float32) * 0.02,
        'b1':    jax.random.normal(keys[4], (D,), jnp.float32) * 0.02,
        'gamma': jnp.ones((D,), jnp.float32),
        'beta':  jnp.zeros((D,), jnp.float32),
        'w2':    jax.random.normal(keys[5], (D, 1), jnp.float32) * 0.02,
        'b2':    jnp.zeros((1,), jnp.float32),
    }

    # synthetic batch_data
    Batch = namedtuple('Batch', ['text', 'span1', 'span2', 'label'])
    text = jax.random.randint(keys[6], (B, T), 0, V)
    text_len = jnp.full((B,), T, jnp.int32)

    starts1 = jax.random.randint(keys[7], (B,), 0, T)
    ends1 = jnp.minimum(starts1 + jax.random.randint(keys[8], (B,), 0, T), T - 1)
    starts2 = jax.random.randint(keys[9], (B,), 0, T)
    ends2 = jnp.minimum(starts2 + jax.random.randint(keys[10], (B,), 0, T), T - 1)
    span1 = jnp.stack([starts1, ends1], axis=1).astype(jnp.int32)
    span2 = jnp.stack([starts2, ends2], axis=1).astype(jnp.int32)
    label = jax.random.bernoulli(keys[11], 0.5, (B,)).astype(jnp.float32)
    batch = Batch(text=(text, text_len), span1=span1, span2=span2, label=label)

    # "encoder": embedding lookup stand-in for BERT (plain-JAX glue), handed to
    # the kernel in bf16 so the dominant HBM stream is half-width.
    # TODO(synk): pretrained transformer encoder + weighing_params not translated.
    encoded_input = params['emb'][batch.text[0]].astype(jnp.bfloat16)   # [B, T, H]

    loss, pred = coref_forward(encoded_input, batch.span1, batch.span2,
                               params, batch.label)
    loss = jax.block_until_ready(loss)
    pred = jax.block_until_ready(pred)

    ref_loss, ref_pred = coref_reference(encoded_input, batch.span1, batch.span2,
                                         params, batch.label)
    assert jnp.allclose(loss, ref_loss, rtol=2e-3, atol=2e-3), (loss, ref_loss)
    assert jnp.allclose(pred, ref_pred, rtol=2e-3, atol=2e-3)

    print("KERNEL_OK")
</pallas_src>

<mosaic_0001>
module attributes {stable_mosaic.version = 11 : i64} {
  func.func @coref_kernel(%arg0: i32, %arg1: memref<8x8x32xbf16, #tpu.memory_space<vmem>>, %arg2: memref<8x2xi32, #tpu.memory_space<vmem>>, %arg3: memref<8x2xi32, #tpu.memory_space<vmem>>, %arg4: memref<32x32xf32, #tpu.memory_space<vmem>>, %arg5: memref<32x32xf32, #tpu.memory_space<vmem>>, %arg6: memref<32x32xf32, #tpu.memory_space<vmem>>, %arg7: memref<8x32xf32, #tpu.memory_space<vmem>>, %arg8: memref<1x1x8xf32, #tpu.memory_space<vmem>>, %arg9: memref<1x1x8xf32, #tpu.memory_space<vmem>>, %arg10: memref<1x1x8xf32, #tpu.memory_space<vmem>>) attributes {dimension_semantics = [#tpu.dimension_semantics<parallel>], iteration_bounds = array<i64: 2>, scalar_prefetch = 0 : i64, scratch_operands = 0 : i64, tpu.core_type = #tpu.core_type<tc>, window_params = [{transform_indices = @transform_0, window_bounds = array<i64: 8, 8, 32>}, {transform_indices = @transform_1, window_bounds = array<i64: 8, 2>}, {transform_indices = @transform_2, window_bounds = array<i64: 8, 2>}, {pipeline_mode = #tpu.pipeline_mode<synchronous>, transform_indices = @transform_3, window_bounds = array<i64: 32, 32>}, {pipeline_mode = #tpu.pipeline_mode<synchronous>, transform_indices = @transform_4, window_bounds = array<i64: 32, 32>}, {pipeline_mode = #tpu.pipeline_mode<synchronous>, transform_indices = @transform_5, window_bounds = array<i64: 32, 32>}, {pipeline_mode = #tpu.pipeline_mode<synchronous>, transform_indices = @transform_6, window_bounds = array<i64: 8, 32>}, {transform_indices = @transform_7, window_bounds = array<i64: 1, 1, 8>}, {transform_indices = @transform_8, window_bounds = array<i64: 1, 1, 8>}, {transform_indices = @transform_9, window_bounds = array<i64: 1, 1, 8>}]} {
    %c0 = arith.constant 0 : index
    %c0_0 = arith.constant 0 : index
    %c0_1 = arith.constant 0 : index
    %0 = vector.load %arg1[%c0, %c0_0, %c0_1] : memref<8x8x32xbf16, #tpu.memory_space<vmem>>, vector<8x8x32xbf16>
    %1 = arith.extf %0 : vector<8x8x32xbf16> to vector<8x8x32xf32>
    %2 = tpu.iota {dimensions = array<i32: 1>} : vector<8x8xi32>
    %c0_2 = arith.constant 0 : index
    %c0_3 = arith.constant 0 : index
    %3 = vector.load %arg2[%c0_2, %c0_3] : memref<8x2xi32, #tpu.memory_space<vmem>>, vector<8x2xi32>
    %4 = vector.extract_strided_slice %3 {offsets = [0, 0], sizes = [8, 1], strides = [1, 1]} : vector<8x2xi32> to vector<8x1xi32>
    %5 = vector.extract_strided_slice %3 {offsets = [0, 1], sizes = [8, 1], strides = [1, 1]} : vector<8x2xi32> to vector<8x1xi32>
    %6 = vector.broadcast %4 : vector<8x1xi32> to vector<8x8xi32>
    %7 = arith.cmpi sge, %2, %6 : vector<8x8xi32>
    %8 = vector.broadcast %5 : vector<8x1xi32> to vector<8x8xi32>
    %9 = arith.cmpi sle, %2, %8 : vector<8x8xi32>
    %10 = arith.andi %7, %9 : vector<8x8xi1>
    %11 = arith.extui %10 : vector<8x8xi1> to vector<8x8xi32>
    %12 = arith.sitofp %11 : vector<8x8xi32> to vector<8x8xf32>
    %cst = arith.constant dense<0.000000e+00> : vector<8xf32>
    %13 = vector.multi_reduction <add>, %12, %cst [1] : vector<8x8xf32> to vector<8xf32>
    %14 = vector.shape_cast %13 : vector<8xf32> to vector<8x1xf32>
    %cst_4 = arith.constant 1.000000e+00 : f32
    %15 = vector.broadcast %cst_4 : f32 to vector<8x1xf32>
    %16 = arith.maximumf %14, %15 : vector<8x1xf32>
    %cst_5 = arith.constant 1.000000e+00 : f32
    %17 = vector.broadcast %cst_5 : f32 to vector<8x1xf32>
    %18 = arith.divf %17, %16 : vector<8x1xf32>
    %19 = vector.broadcast %18 : vector<8x1xf32> to vector<8x8xf32>
    %20 = arith.mulf %12, %19 : vector<8x8xf32>
    %c0_6 = arith.constant 0 : index
    %c0_7 = arith.constant 0 : index
    %21 = vector.load %arg3[%c0_6, %c0_7] : memref<8x2xi32, #tpu.memory_space<vmem>>, vector<8x2xi32>
    %22 = vector.extract_strided_slice %21 {offsets = [0, 0], sizes = [8, 1], strides = [1, 1]} : vector<8x2xi32> to vector<8x1xi32>
    %23 = vector.extract_strided_slice %21 {offsets = [0, 1], sizes = [8, 1], strides = [1, 1]} : vector<8x2xi32> to vector<8x1xi32>
    %24 = vector.broadcast %22 : vector<8x1xi32> to vector<8x8xi32>
    %25 = arith.cmpi sge, %2, %24 : vector<8x8xi32>
    %26 = vector.broadcast %23 : vector<8x1xi32> to vector<8x8xi32>
    %27 = arith.cmpi sle, %2, %26 : vector<8x8xi32>
    %28 = arith.andi %25, %27 : vector<8x8xi1>
    %29 = arith.extui %28 : vector<8x8xi1> to vector<8x8xi32>
    %30 = arith.sitofp %29 : vector<8x8xi32> to vector<8x8xf32>
    %cst_8 = arith.constant dense<0.000000e+00> : vector<8xf32>
    %31 = vector.multi_reduction <add>, %30, %cst_8 [1] : vector<8x8xf32> to vector<8xf32>
    %32 = vector.shape_cast %31 : vector<8xf32> to vector<8x1xf32>
    %cst_9 = arith.constant 1.000000e+00 : f32
    %33 = vector.broadcast %cst_9 : f32 to vector<8x1xf32>
    %34 = arith.maximumf %32, %33 : vector<8x1xf32>
    %cst_10 = arith.constant 1.000000e+00 : f32
    %35 = vector.broadcast %cst_10 : f32 to vector<8x1xf32>
    %36 = arith.divf %35, %34 : vector<8x1xf32>
    %37 = vector.broadcast %36 : vector<8x1xf32> to vector<8x8xf32>
    %38 = arith.mulf %30, %37 : vector<8x8xf32>
    %39 = vector.shape_cast %20 : vector<8x8xf32> to vector<8x8x1xf32>
    %40 = vector.broadcast %39 : vector<8x8x1xf32> to vector<8x8x32xf32>
    %41 = arith.mulf %1, %40 : vector<8x8x32xf32>
    %cst_11 = arith.constant dense<0.000000e+00> : vector<8x32xf32>
    %42 = vector.multi_reduction <add>, %41, %cst_11 [1] : vector<8x8x32xf32> to vector<8x32xf32>
    %43 = vector.shape_cast %38 : vector<8x8xf32> to vector<8x8x1xf32>
    %44 = vector.broadcast %43 : vector<8x8x1xf32> to vector<8x8x32xf32>
    %45 = arith.mulf %1, %44 : vector<8x8x32xf32>
    %cst_12 = arith.constant dense<0.000000e+00> : vector<8x32xf32>
    %46 = vector.multi_reduction <add>, %45, %cst_12 [1] : vector<8x8x32xf32> to vector<8x32xf32>
    %c0_13 = arith.constant 0 : index
    %c0_14 = arith.constant 0 : index
    %47 = vector.load %arg7[%c0_13, %c0_14] : memref<8x32xf32, #tpu.memory_space<vmem>>, vector<1x32xf32>
    %c0_15 = arith.constant 0 : index
    %c0_16 = arith.constant 0 : index
    %48 = vector.load %arg4[%c0_15, %c0_16] : memref<32x32xf32, #tpu.memory_space<vmem>>, vector<32x32xf32>
    %cst_17 = arith.constant dense<0.000000e+00> : vector<8x32xf32>
    %49 = tpu.matmul %42, %48, %cst_17 {dimension_numbers = #tpu.dot_dimension_numbers<[1], [0], [0], [1], [0, 0, 1, 1], [], []>} : vector<8x32xf32>, vector<32x32xf32>, vector<8x32xf32> -> vector<8x32xf32>
    %50 = vector.broadcast %47 : vector<1x32xf32> to vector<8x32xf32>
    %51 = arith.addf %49, %50 : vector<8x32xf32>
    %c0_18 = arith.constant 0 : index
    %c0_19 = arith.constant 0 : index
    %52 = vector.load %arg4[%c0_18, %c0_19] : memref<32x32xf32, #tpu.memory_space<vmem>>, vector<32x32xf32>
    %cst_20 = arith.constant dense<0.000000e+00> : vector<8x32xf32>
    %53 = tpu.matmul %46, %52, %cst_20 {dimension_numbers = #tpu.dot_dimension_numbers<[1], [0], [0], [1], [0, 0, 1, 1], [], []>} : vector<8x32xf32>, vector<32x32xf32>, vector<8x32xf32> -> vector<8x32xf32>
    %54 = vector.broadcast %47 : vector<1x32xf32> to vector<8x32xf32>
    %55 = arith.addf %53, %54 : vector<8x32xf32>
    %c1 = arith.constant 1 : index
    %c0_21 = arith.constant 0 : index
    %56 = vector.load %arg7[%c1, %c0_21] : memref<8x32xf32, #tpu.memory_space<vmem>>, vector<1x32xf32>
    %c0_22 = arith.constant 0 : index
    %c0_23 = arith.constant 0 : index
    %57 = vector.load %arg5[%c0_22, %c0_23] : memref<32x32xf32, #tpu.memory_space<vmem>>, vector<32x32xf32>
    %cst_24 = arith.constant dense<0.000000e+00> : vector<8x32xf32>
    %58 = tpu.matmul %51, %57, %cst_24 {dimension_numbers = #tpu.dot_dimension_numbers<[1], [0], [0], [1], [0, 0, 1, 1], [], []>} : vector<8x32xf32>, vector<32x32xf32>, vector<8x32xf32> -> vector<8x32xf32>
    %c0_25 = arith.constant 0 : index
    %c0_26 = arith.constant 0 : index
    %59 = vector.load %arg6[%c0_25, %c0_26] : memref<32x32xf32, #tpu.memory_space<vmem>>, vector<32x32xf32>
    %cst_27 = arith.constant dense<0.000000e+00> : vector<8x32xf32>
    %60 = tpu.matmul %55, %59, %cst_27 {dimension_numbers = #tpu.dot_dimension_numbers<[1], [0], [0], [1], [0, 0, 1, 1], [], []>} : vector<8x32xf32>, vector<32x32xf32>, vector<8x32xf32> -> vector<8x32xf32>
    %61 = arith.addf %58, %60 : vector<8x32xf32>
    %62 = vector.broadcast %56 : vector<1x32xf32> to vector<8x32xf32>
    %63 = arith.addf %61, %62 : vector<8x32xf32>
    %64 = math.tanh %63 : vector<8x32xf32>
    %c2 = arith.constant 2 : index
    %c0_28 = arith.constant 0 : index
    %65 = vector.load %arg7[%c2, %c0_28] : memref<8x32xf32, #tpu.memory_space<vmem>>, vector<1x32xf32>
    %c3 = arith.constant 3 : index
    %c0_29 = arith.constant 0 : index
    %66 = vector.load %arg7[%c3, %c0_29] : memref<8x32xf32, #tpu.memory_space<vmem>>, vector<1x32xf32>
    %cst_30 = arith.constant dense<0.000000e+00> : vector<8xf32>
    %67 = vector.multi_reduction <add>, %64, %cst_30 [1] : vector<8x32xf32> to vector<8xf32>
    %68 = vector.shape_cast %67 : vector<8xf32> to vector<8x1xf32>
    %cst_31 = arith.constant 3.200000e+01 : f32
    %69 = vector.broadcast %cst_31 : f32 to vector<8x1xf32>
    %70 = arith.divf %68, %69 : vector<8x1xf32>
    %71 = vector.broadcast %70 : vector<8x1xf32> to vector<8x32xf32>
    %72 = arith.subf %64, %71 : vector<8x32xf32>
    %73 = arith.mulf %72, %72 : vector<8x32xf32>
    %cst_32 = arith.constant dense<0.000000e+00> : vector<8xf32>
    %74 = vector.multi_reduction <add>, %73, %cst_32 [1] : vector<8x32xf32> to vector<8xf32>
    %75 = vector.shape_cast %74 : vector<8xf32> to vector<8x1xf32>
    %cst_33 = arith.constant 3.200000e+01 : f32
    %76 = vector.broadcast %cst_33 : f32 to vector<8x1xf32>
    %77 = arith.divf %75, %76 : vector<8x1xf32>
    %cst_34 = arith.constant 9.99999974E-6 : f32
    %78 = vector.broadcast %cst_34 : f32 to vector<8x1xf32>
    %79 = arith.addf %77, %78 : vector<8x1xf32>
    %80 = math.rsqrt %79 : vector<8x1xf32>
    %81 = vector.broadcast %80 : vector<8x1xf32> to vector<8x32xf32>
    %82 = arith.mulf %72, %81 : vector<8x32xf32>
    %83 = vector.broadcast %65 : vector<1x32xf32> to vector<8x32xf32>
    %84 = arith.mulf %82, %83 : vector<8x32xf32>
    %85 = vector.broadcast %66 : vector<1x32xf32> to vector<8x32xf32>
    %86 = arith.addf %84, %85 : vector<8x32xf32>
    %c4 = arith.constant 4 : index
    %c0_35 = arith.constant 0 : index
    %87 = vector.load %arg7[%c4, %c0_35] : memref<8x32xf32, #tpu.memory_space<vmem>>, vector<1x32xf32>
    %c5 = arith.constant 5 : index
    %c0_36 = arith.constant 0 : index
    %88 = vector.load %arg7[%c5, %c0_36] : memref<8x32xf32, #tpu.memory_space<vmem>>, vector<1x1xf32>
    %cst_37 = arith.constant dense<0.000000e+00> : vector<1x8xf32>
    %89 = tpu.matmul %87, %86, %cst_37 {dimension_numbers = #tpu.dot_dimension_numbers<[1], [1], [0], [0], [0, 0, 1, 0], [], []>} : vector<1x32xf32>, vector<8x32xf32>, vector<1x8xf32> -> vector<1x8xf32>
    %90 = vector.broadcast %88 : vector<1x1xf32> to vector<1x8xf32>
    %91 = arith.addf %89, %90 : vector<1x8xf32>
    %92 = arith.negf %91 : vector<1x8xf32>
    %93 = math.exp %92 : vector<1x8xf32>
    %cst_38 = arith.constant 1.000000e+00 : f32
    %94 = vector.broadcast %cst_38 : f32 to vector<1x8xf32>
    %95 = arith.addf %94, %93 : vector<1x8xf32>
    %96 = arith.divf %94, %95 : vector<1x8xf32>
    %c0_39 = arith.constant 0 : index
    %c0_40 = arith.constant 0 : index
    %c0_41 = arith.constant 0 : index
    %97 = vector.load %arg8[%c0_39, %c0_40, %c0_41] : memref<1x1x8xf32, #tpu.memory_space<vmem>>, vector<1x1x8xf32>
    %98 = vector.shape_cast %97 : vector<1x1x8xf32> to vector<1x8xf32>
    %cst_42 = arith.constant 1.000000e-07 : f32
    %cst_43 = arith.constant 0.99999988 : f32
    %99 = vector.broadcast %cst_42 : f32 to vector<1x8xf32>
    %100 = arith.maximumf %99, %96 : vector<1x8xf32>
    %101 = vector.broadcast %cst_43 : f32 to vector<1x8xf32>
    %102 = arith.minimumf %101, %100 : vector<1x8xf32>
    %103 = math.log %102 : vector<1x8xf32>
    %104 = arith.mulf %98, %103 : vector<1x8xf32>
    %cst_44 = arith.constant 1.000000e+00 : f32
    %105 = vector.broadcast %cst_44 : f32 to vector<1x8xf32>
    %106 = arith.subf %105, %98 : vector<1x8xf32>
    %cst_45 = arith.constant 1.000000e+00 : f32
    %107 = vector.broadcast %cst_45 : f32 to vector<1x8xf32>
    %108 = arith.subf %107, %102 : vector<1x8xf32>
    %109 = math.log %108 : vector<1x8xf32>
    %110 = arith.mulf %106, %109 : vector<1x8xf32>
    %111 = arith.addf %104, %110 : vector<1x8xf32>
    %cst_46 = arith.constant 0.000000e+00 : f32
    %112 = vector.broadcast %cst_46 : f32 to vector<1x8xf32>
    %113 = arith.subf %112, %111 : vector<1x8xf32>
    %114 = vector.shape_cast %96 : vector<1x8xf32> to vector<1x1x8xf32>
    %c0_47 = arith.constant 0 : index
    %c0_48 = arith.constant 0 : index
    %c0_49 = arith.constant 0 : index
    %115 = vector.load %arg9[%c0_47, %c0_48, %c0_49] : memref<1x1x8xf32, #tpu.memory_space<vmem>>, vector<1x1x8xf32>
    tpu.vector_store %arg9[%c0_47, %c0_48, %c0_49], %114 {strides = array<i32>} : memref<1x1x8xf32, #tpu.memory_space<vmem>>, vector<1x1x8xf32>,
    %116 = vector.shape_cast %113 : vector<1x8xf32> to vector<1x1x8xf32>
    %c0_50 = arith.constant 0 : index
    %c0_51 = arith.constant 0 : index
    %c0_52 = arith.constant 0 : index
    %117 = vector.load %arg10[%c0_50, %c0_51, %c0_52] : memref<1x1x8xf32, #tpu.memory_space<vmem>>, vector<1x1x8xf32>
    tpu.vector_store %arg10[%c0_50, %c0_51, %c0_52], %116 {strides = array<i32>} : memref<1x1x8xf32, #tpu.memory_space<vmem>>, vector<1x1x8xf32>,
    return
  }
  func.func @transform_0(%arg0: i32) -> (i32, i32, i32) {
    %c0_i32 = arith.constant 0 : i32
    %c0_i32_0 = arith.constant 0 : i32
    %c0_i32_1 = arith.constant 0 : i32
    return %arg0, %c0_i32, %c0_i32_0 : i32, i32, i32
  }
  func.func @transform_1(%arg0: i32) -> (i32, i32) {
    %c0_i32 = arith.constant 0 : i32
    %c0_i32_0 = arith.constant 0 : i32
    return %arg0, %c0_i32 : i32, i32
  }
  func.func @transform_2(%arg0: i32) -> (i32, i32) {
    %c0_i32 = arith.constant 0 : i32
    %c0_i32_0 = arith.constant 0 : i32
    return %arg0, %c0_i32 : i32, i32
  }
  func.func @transform_3(%arg0: i32) -> (i32, i32) {
    %c0_i32 = arith.constant 0 : i32
    %c0_i32_0 = arith.constant 0 : i32
    %c0_i32_1 = arith.constant 0 : i32
    return %c0_i32, %c0_i32_0 : i32, i32
  }
  func.func @transform_4(%arg0: i32) -> (i32, i32) {
    %c0_i32 = arith.constant 0 : i32
    %c0_i32_0 = arith.constant 0 : i32
    %c0_i32_1 = arith.constant 0 : i32
    return %c0_i32, %c0_i32_0 : i32, i32
  }
  func.func @transform_5(%arg0: i32) -> (i32, i32) {
    %c0_i32 = arith.constant 0 : i32
    %c0_i32_0 = arith.constant 0 : i32
    %c0_i32_1 = arith.constant 0 : i32
    return %c0_i32, %c0_i32_0 : i32, i32
  }
  func.func @transform_6(%arg0: i32) -> (i32, i32) {
    %c0_i32 = arith.constant 0 : i32
    %c0_i32_0 = arith.constant 0 : i32
    %c0_i32_1 = arith.constant 0 : i32
    return %c0_i32, %c0_i32_0 : i32, i32
  }
  func.func @transform_7(%arg0: i32) -> (i32, i32, i32) {
    %c0_i32 = arith.constant 0 : i32
    %c0_i32_0 = arith.constant 0 : i32
    %c0_i32_1 = arith.constant 0 : i32
    return %arg0, %c0_i32, %c0_i32_0 : i32, i32, i32
  }
  func.func @transform_8(%arg0: i32) -> (i32, i32, i32) {
    %c0_i32 = arith.constant 0 : i32
    %c0_i32_0 = arith.constant 0 : i32
    %c0_i32_1 = arith.constant 0 : i32
    return %arg0, %c0_i32, %c0_i32_0 : i32, i32, i32
  }
  func.func @transform_9(%arg0: i32) -> (i32, i32, i32) {
    %c0_i32 = arith.constant 0 : i32
    %c0_i32_0 = arith.constant 0 : i32
    %c0_i32_1 = arith.constant 0 : i32
    return %arg0, %c0_i32, %c0_i32_0 : i32, i32, i32
  }
}

</mosaic_0001>

<bundles_post_ra>
// kernel: tpu_custom_call.1
= control target key start
LH: loop header
LB: loop body
LE: loop exit
PB: predicated region body
PF: predicated region fallthrough
CT: control target
= control target key end

     0   :  { %s2192_s0 = inlined_call_operand.hbm [shape: bf16[16,8,32], index: 0, kind: input, shape index: {}]   ;;  %s2193_s1 = inlined_call_operand.vmem [shape: s32[16,2], index: 1, kind: input, shape index: {}]   ;;  %s2194_s2 = inlined_call_operand.vmem [shape: s32[16,2], index: 2, kind: input, shape index: {}]   ;;  %s2195_s3 = inlined_call_operand.vmem [shape: f32[32,32], index: 3, kind: input, shape index: {}]   ;;  %s2196_s4 = inlined_call_operand.hbm [shape: f32[32,32], index: 4, kind: input, shape index: {}]   ;;  %s2197_s5 = inlined_call_operand.hbm [shape: f32[32,32], index: 5, kind: input, shape index: {}]   ;;  %s2198_s6 = inlined_call_operand.vmem [shape: f32[8,32], index: 6, kind: input, shape index: {}]   ;;  %s2199_s7 = inlined_call_operand.vmem [shape: f32[2,1,8], index: 7, kind: input, shape index: {}]   ;;  %s2200_s8 = inlined_call_operand.hbm [shape: f32[2,1,8], index: 8, kind: output, shape index: {0}]   ;;  %s2201_s9 = inlined_call_operand.hbm [shape: f32[2,1,8], index: 9, kind: output, shape index: {1}]  }
   0x1   :  { %2206 = sst [smem:[#allocation16_spill]] %s2196_s4 }
   0x2   :  { %2207 = sst [smem:[#allocation17_spill]] %s2197_s5 }
   0x3   :  { %15 = vsyncpa [#allocation3], 0 }
   0x4   :  { %17 = vsyncpa [#allocation3 + $0x1], 0 }
   0x5   :  { %18 = vsyncpa [#allocation6], 0 }
   0x6   :  { %19 = vsyncpa [#allocation4], 0 }
   0x7   :  { %21 = vsyncpa [#allocation4 + $0x1], 0 }
   0x8   :  { %22 = vsyncpa [#allocation10], 0 }
   0x9   :  { %24 = vsyncpa [#allocation10 + $0x1], 0  ;;  %s1860_s30 = smov 0   ;;  %s1862_s10 = smov 0  }
   0xa   :  { %s1864_s11 = smov 0   ;;  %s1866_s12 = smov 0  }
   0xb LB: > { %s1881_s13 = sadd.s32 4294967295, %s1795_s12   ;;  %s1394_s14 = sadd.s32 4294967294, %s1795_s12   ;;  %s1795_s12 = sphi %s1866_s12, %s2229_s12   ;;  %s1791_s11 = sphi %s1864_s11, %s2228_s11   ;;  %s1787_s10 = sphi %s1862_s10, %s2227_s10   ;;  %s1783_s30 = sphi %s1860_s30, %s2226_s30  }
   0xc   : > { %p50_p0 = scmp.ne.s32.totalorder %s1787_s10, %s1783_s30  ;;  %p2202_p1 = scmp.eq.s32.totalorder %s1881_s13, 0 }
   0xd   : > { %p242_p3 = scmp.eq.s32.totalorder %s1394_s14, 1  ;;  %p1395_p5 = scmp.ge.s32.totalorder %s1795_s12, 1 }
   0xe   : > { %p1890_p4 = por %p2202_p1, %p50_p0  ;;  %p275_p7 = scmp.lt.s32.totalorder %s1795_s12, 3 }
   0xf   : > { %p1895_p6 = por %p242_p3, %p50_p0  ;;  %s1797_s18 = smov [#allocation5]  }
  0x10   : > { %s2208_s15 = scalar_select %p1890_p4, 1, 0 }
  0x11   : > { %s2209_s16 = scalar_select %p1895_p6, 1, 0 }
  0x12   : > { %p1900_p8 = pnand %p1395_p5, %p275_p7  ;;  %s290_s19 = sshll.u32 %s1797_s18, 4  ;;  %s291_s19 = int_to_ptr.vmem [resolvable:$true] %s290_s19 }
  0x13   : > { %s1798_s21 = smov [#allocation7]   ;;  %s1628_s23 = scalar_lea.vmem %s291_s19, 512 }
  0x14   : > { %s2210_s17 = scalar_select %p1900_p8, 1, 0 }
  0x15   : > { %p1530_p9 = pneg %p1900_p8  ;;  %s303_s22 = sshll.u32 %s1798_s21, 4  ;;  %s304_s22 = int_to_ptr.vmem [resolvable:$true] %s303_s22 }
  0x16   : > { %p1629_p13 = scmp.ne.s32.totalorder %s291_s19, %s1628_s23  ;;  %p1636_p5 = scmp.lt.s32.totalorder %s291_s19, %s291_s19 }
  0x17   : > { %p1909_p11 = pnand %p1530_p9, %p2202_p1  ;;  %p1637_p7 = scmp.lt.s32.totalorder %s1628_s23, %s1628_s23 }
  0x19   : > { %p1619_p12 = pneg %p1909_p11  ;;  %p1638_p10 = por %p1637_p7, %p1636_p5 }
  0x1b   : > { %p1631_p0 = pnand %p1629_p13, %p1619_p12 }
  0x1d   : > { %p1632_p3 = pneg %p1631_p0 }
  0x1f   : > { %p1639_p9 = pnand %p1638_p10, %p1632_p3 }
  0x21   : > { %1642 = shalt.err (!%p1639_p9)
}
  0x22   : > { %s1799_s24 = smov 128   ;;  %s1800_s25 = smov 8  }
  0x23   : > { %s2212_s4 = sld [smem:[#allocation16_spill]]  ;;  %s1654_s28 = scalar_lea.vmem %s304_s22, 512 }
  0x24   : > { %p1655_p1 = scmp.ne.s32.totalorder %s304_s22, %s1654_s28  ;;  %p1662_p2 = scmp.lt.s32.totalorder %s304_s22, %s304_s22 }
  0x25   : > { %p1663_p6 = scmp.lt.s32.totalorder %s1654_s28, %s1654_s28 }
  0x26   : > { %p1657_p13 = pnand %p1655_p1, %p1619_p12 }
  0x27   : > { %p1664_p5 = por %p1663_p6, %p1662_p2 }
  0x28   : > { %p1658_p0 = pneg %p1657_p13 }
  0x29   : > { %1533 = dma.hbm_to_vmem [thread:$0]  (!%p1909_p11), %s2212_s4, 512, %s291_s19, [#allocation6], %s1799_s24, %s1799_s24, %s1800_s25  }
  0x2a   : > { %p1665_p10 = pnand %p1664_p5, %p1658_p0 }
  0x2c   : > { %1668 = shalt.err (!%p1665_p10)
}
  0x2d   : > { %s2213_s5 = sld [smem:[#allocation17_spill]]  ;;  %s1932_s18 = sadd.s32 1, %s1795_s12  }
  0x2e   : > { %s37_s19 = sadd.s32 1, %s1791_s11  ;;  %s34_s20 = ssub.s32 %s1795_s12, %s1932_s18 }
  0x2f   : > { %p44_p1 = scmp.ne.s32.totalorder %s1791_s11, %s1787_s10  ;;  %p35_p2 = scmp.eq.s32.totalorder %s34_s20, 0 }
  0x30   : > { %p45_p6 = scmp.eq.s32.totalorder %s1795_s12, 0  ;;  %p2214_p12 = scmp.eq.s32.totalorder %s1881_s13, 1 }
  0x31   : > { %p1550_p7 = scmp.lt.s32.totalorder %s1795_s12, 2  ;;  %s320_s26 = sand.u32 1, %s1791_s11  }
  0x32   : > { %p1942_p3 = por %p2214_p12, %p44_p1  ;;  %p46_p9 = por %p45_p6, %p44_p1 }
  0x33   : > { %1536 = dma.hbm_to_vmem [thread:$0]  (!%p1909_p11), %s2213_s5, 512, %s304_s22, [#allocation6], %s1799_s24, %s1799_s24, %s1800_s25  }
  0x34   : > { %s2215_s21 = scalar_select %p1942_p3, 1, 0 }
  0x35   : > { %s1948_s23 = scalar_select %p35_p2, %s1791_s11, %s37_s19  }
  0x36   : > { %s1399_s27 = sshll.u32 %s320_s26, 5  ;;  %s1425_s22 = sshll.u32 %s1795_s12, 9 }
  0x37   : > { %2216 = sst [smem:[#allocation15_spill]] %s1948_s23  ;;  %s1955_s28 = scalar_lea.hbm %s2192_s0, %s1425_s22 }
  0x38   : > { %s324_s29 = scalar_lea.vmem [#allocation2], %s1399_s27  ;;  %p1959_p11 = pnand %p1550_p7, %p46_p9 }
  0x39   : > { %s331_s14 = sshll.u32 %s324_s29, 4  ;;  %s1963_s19 = scalar_lea.sflag [#allocation3], %s320_s26  ;;  %s1957_s14 = int_to_ptr.vmem [resolvable:$true] %s331_s14 }
  0x3a   : > { %s1669_s4 = scalar_lea.hbm %s1955_s28, 512  ;;  %p1671_p0 = pneg %p1959_p11 }
  0x3b   : > { %p1670_p13 = scmp.ne.s32.totalorder %s1955_s28, %s1669_s4  ;;  %s1674_s27 = scalar_lea.hbm %s2192_s0, 1024 }
  0x3c   : > { %p1675_p1 = scmp.lt.s32.totalorder %s1955_s28, %s2192_s0  ;;  %p1676_p2 = scmp.lt.s32.totalorder %s1674_s27, %s1669_s4 }
  0x3d   : > { %p1672_p5 = pnand %p1671_p0, %p1670_p13 }
  0x3e   : > { %p1677_p6 = por %p1676_p2, %p1675_p1 }
  0x3f   : > { %p1673_p10 = pneg %p1672_p5 }
  0x41   : > { %p1678_p12 = pnand %p1677_p6, %p1673_p10 }
  0x43   : > { %1681 = shalt.err (!%p1678_p12)
}
  0x44   : > { %s1682_s26 = scalar_lea.vmem %s1957_s14, 512  ;;  %s1801_s5 = smov [#allocation2]  }
  0x45   : > { %p1683_p7 = scmp.ne.s32.totalorder %s1957_s14, %s1682_s26  ;;  %s1687_s23 = sshll.u32 %s1801_s5, 4  ;;  %s1688_s23 = int_to_ptr.vmem [resolvable:$false] %s1687_s23 }
  0x46   : > { %s1689_s22 = scalar_lea.vmem %s1688_s23, 1024  ;;  %p1690_p5 = scmp.lt.s32.totalorder %s1957_s14, %s1688_s23 }
  0x47   : > { %p1685_p9 = pnand %p1683_p7, %p1671_p0  ;;  %p1691_p3 = scmp.lt.s32.totalorder %s1689_s22, %s1682_s26 }
  0x49   : > { %p1686_p13 = pneg %p1685_p9  ;;  %p1692_p4 = por %p1691_p3, %p1690_p5 }
  0x4b   : > { %p1693_p8 = pnand %p1692_p4, %p1686_p13 }
  0x4d   : > { %1696 = shalt.err (!%p1693_p8)
}
  0x4e   : > { %s1802_s4 = smov 64   ;;  %s1803_s24 = smov 4  }
  0x4f   : > { %1540 = dma.hbm_to_vmem [thread:$0]  (!%p1959_p11), %s1955_s28, 512, %s1957_s14, %s1963_s19, %s1802_s4, %s1802_s4, %s1803_s24  }
  0x50   : > { %p2218_p0 = scmp.ne.s32.totalorder %s2210_s17, 0 }
  0x51   : > { %s1987_s5 = sand.u32 (!%p2218_p0), 1, %s1787_s10   ;;  %p2219_p4 = scmp.ne.s32.totalorder (!%p2218_p0), %s2208_s15, 0 }
  0x52   : > { %363 = sbr.rel (%p2218_p0) target bundleno = 1544 (0x608), region = 52  ;;  %s1403_s23 = sshll.u32 (!%p2218_p0), %s1987_s5, 5 }
  0x53   : > { %s366_s27 = scalar_lea.sflag (!%p2218_p0), [#allocation3], %s1987_s5  ;;  %s1991_s25 = scalar_lea.vmem (!%p2218_p0), [#allocation2], %s1403_s23 }
  0x57   : > { %1766 = dma.done.wait (%p2219_p4), %s366_s27, 512  }
  0x58   : > { %1768 = vsyncadd (%p2219_p4), %s366_s27, 4294966784  ;;  %p2220_p8 = scmp.eq.s32.totalorder %s1881_s13, 0 }
  0x5a   : > { %1770 = dma.done.wait (%p2220_p8), [#allocation6], 1024   ;;  %p2221_p3 = pmov %p2220_p8 }
  0x5b   : > { %p427_p11 = scmp.lt.s32.totalorder %s1881_s13, 1  ;;  %v1804_v0 = vmov 0   ;;  %v1805_v3 = vmov 1   ;;  %v1806_v4 = vmov 0.0   ;;  %v454_v5 = vlaneseq  ;;  %v740_v48 = vld [vmem:[%s2195_s3 + $0x18] sm:$0xff]  ;;  %v739_v49 = vld [vmem:[%s2195_s3 + $0x10] sm:$0xff] }
  0x5c   : > { %1772 = vsyncadd (%p2221_p3), [#allocation6], 4294966272  ;;  %1598 = vset.pattern.permute.xlu1 %v1804_v0  ;;  %1596 = vset.pattern.permute.xlu0 %v1804_v0  ;;  %vm468_vm3 = vcmask 64512   ;;  %v738_v50 = vld [vmem:[%s2195_s3 + $0x8] sm:$0xff]  ;;  %v737_v51 = vld [vmem:[%s2195_s3] sm:$0xff]  ;;  %vm1807_vm7 = vmmov 0  }
  0x5d   : > { %s2003_s17 = scalar_select %p427_p11, %s1881_s13, 1  ;;  %1467 = vmatprep.subr.mxu0 %v1806_v4  ;;  %1478 = vmatprep.subr.mxu1 %v1806_v4  ;;  %v455_v8 = vand.u32 127, %v454_v5  ;;  %v496_v19 = vshrl.u32 %v454_v5, 7  ;;  %v1427_v52 = vld [vmem:[%s1991_s25] sm:$0xff]   ;;  %vm559_vm8 = vcmask 261120   ;;  %v1442_v59 = vld [vmem:[%s1991_s25 + $0x8] sm:$0xff]  }
  0x5e   : > { %1468 = vmatpush3.msra.mxu0 %v740_v48  ;;  %1479 = vmatpush3.msra.mxu1 %v740_v48  ;;  %v1429_v53 = vunpack.c.h.bf16 %v1427_v52  ;;  %v1428_v54 = vunpack.c.l.bf16 %v1427_v52  ;;  %v1432_v5 = vunpack.c.l.bf16 %v1442_v59  ;;  %vm753_vm9 = vcmask 1041409   ;;  %s1421_s20 = sshll.u32 %s1881_s13, 4  ;;  %s1219_s22 = scalar_lea.sflag [#allocation4], %s1987_s5 }
  0x5f   : > { %s1406_s28 = sshll.u32 %s2003_s17, 3  ;;  %v504_v21 = vsub.s32 1, %v496_v19  ;;  %v497_v22 = vsub.s32 0, %v496_v19  ;;  %v511_v30 = vsub.s32 2, %v496_v19  ;;  %v518_v33 = vsub.s32 3, %v496_v19  ;;  %1469 = vmatprep.subr.mxu0 %v1806_v4  ;;  %1480 = vmatprep.subr.mxu1 %v1806_v4  ;;  %p2222_p1 = scmp.ne.s32.totalorder %s2215_s21, 0 }
  0x60   : > { %s434_s15 = scalar_lea.vmem %s2194_s2, %s1406_s28  ;;  %s430_s26 = scalar_lea.vmem %s2193_s1, %s1406_s28  ;;  %v525_v36 = vsub.s32 4, %v496_v19  ;;  %v532_v39 = vsub.s32 5, %v496_v19  ;;  %v539_v42 = vsub.s32 6, %v496_v19  ;;  %v546_v45 = vsub.s32 7, %v496_v19  ;;  %1470 = vmatpush3.msra.mxu0 %v739_v49  ;;  %1481 = vmatpush3.msra.mxu1 %v739_v49 }
  0x61   : > { %v476_v1 = vld [vmem:[%s434_s15] sm:$0xff]  ;;  %1471 = vmatprep.subr.mxu0 %v1806_v4  ;;  %1482 = vmatprep.subr.mxu1 %v1806_v4  ;;  %vm755_vm10 = vcmask 1042434   ;;  %vm757_vm11 = vcmask 1043459   ;;  %vm759_vm12 = vcmask 1044484   ;;  %vm761_vm13 = vcmask 1045509   ;;  %s1808_s24 = smov [#allocation8]  }
  0x62   : > { %v456_v2 = vld [vmem:[%s430_s26] sm:$0xff]  ;;  %478 = vperm.xlu1 %1598, %v476_v1   ;;  %1472 = vmatpush3.msra.mxu0 %v738_v50  ;;  %vm763_vm14 = vcmask 1046534   ;;  %vm765_vm15 = vcmask 1047559   ;;  %s2124_s26 = scalar_lea.hbm %s2200_s8, %s1421_s20  ;;  %s1701_s23 = sshll.u32 %s1808_s24, 4  ;;  %s1702_s23 = int_to_ptr.vmem [resolvable:$false] %s1701_s23 }
  0x63   : > { %458 = vperm.xlu0 %1596, %v456_v2   ;;  %1483 = vmatpush3.msra.mxu1 %v738_v50  ;;  %s1703_s27 = scalar_lea.vmem %s1702_s23, 32 }
  0x64   : > { %1473 = vmatprep.subr.mxu0 %v1806_v4  ;;  %1484 = vmatprep.subr.mxu1 %v1806_v4 }
  0x65   : > { %1474 = vmatpush3.msra.mxu0 %v737_v51  ;;  %1475 = vmatprep.mubr.msk.f32.mxu0 %vm1807_vm7, %v1806_v4 }
  0x66   : > { %1599 = vset.pattern.permute.xlu1 %v1805_v3  ;;  %1485 = vmatpush3.msra.mxu1 %v737_v51 }
  0x67   : > { %1597 = vset.pattern.permute.xlu0 %v1805_v3  ;;  %482 = vperm.xlu1 %1599, %v476_v1  }
  0x68   : > { %462 = vperm.xlu0 %1597, %v456_v2   ;;  %1486 = vmatprep.mubr.msk.f32.mxu1 %vm1807_vm7, %v1806_v4 }
  0x69   : > { %1489 = vmatprep.subr.mxu0 %v1806_v4  ;;  %1500 = vmatprep.subr.mxu1 %v1806_v4 }
  0x6c   : > { %1600 = vset.pattern.permute.xlu0 %v1804_v0 }
  0xdd   : > { %v479_v7 = vpop.permute.xlu1 %478 }
  0xde   : > { %v459_v6 = vpop.permute.xlu0 %458  ;;  %vm480_vm0 = vcmp.ge.s32.totalorder %v455_v8, %v479_v7 }
  0xdf   : > { %vm460_vm4 = vcmp.ge.s32.totalorder %v455_v8, %v459_v6 }
  0xe2   : > { %v483_v9 = vpop.permute.xlu1 %482 }
  0xe3   : > { %v463_v10 = vpop.permute.xlu0 %462  ;;  %vm484_vm1 = vcmp.le.s32.totalorder %v455_v8, %v483_v9 }
  0xe4   : > { %vm464_vm2 = vcmp.le.s32.totalorder %v455_v8, %v463_v10  ;;  %vm485_vm5 = vmand %vm480_vm0, %vm484_vm1  ;;  %vm1215_vm0 = vcmask 57344  }
  0xe5   : > { %vm465_vm6 = vmand %vm460_vm4, %vm464_vm2  ;;  %v1409_v11 = vsel %vm485_vm5, 1.0, %v1806_v4 }
  0xe6   : > { %v488_v12 = vsel %vm468_vm3, %v1409_v11, 0.0  ;;  %v1408_v13 = vsel %vm465_vm6, 1.0, %v1806_v4 }
  0xe7   : > { %489 = vadd.xlane.f32.xlu0 %v488_v12  ;;  %v469_v14 = vsel %vm468_vm3, %v1408_v13, 0.0 }
  0xe8   : > { %470 = vadd.xlane.f32.xlu1 %v469_v14 }
 0x170   : > { %v490_v15 = vpop.xlane.xlu0 %489 }
 0x171   : > { %v471_v16 = vpop.xlane.xlu1 %470  ;;  %v491_v17 = vmax.f32 %v490_v15, 1.0 }
 0x172   : > { %v472_v18 = vmax.f32 %v471_v16, 1.0 }
 0x173   : > { %1601 = vrcp.f32 %v491_v17  ;;  %v1433_v17 = vunpack.c.h.bf16 %v1442_v59 }
 0x174   : > { %1603 = vrcp.f32 %v472_v18  ;;  %v1443_v18 = vld [vmem:[%s1991_s25 + $0x10] sm:$0xff]  }
 0x180   : > { %v1602_v20 = vpop.eup %1601 }
 0x181   : > { %v1604_v23 = vpop.eup %1603  ;;  %v494_v25 = vmul.f32 %v1602_v20, %v1409_v11 }
 0x182   : > { %v475_v24 = vmul.f32 %v1604_v23, %v1408_v13 }
 0x183   : > { %v626_v28 = vrot.slane %v494_v25, %v504_v21  ;;  %v619_v29 = vrot.slane %v494_v25, %v497_v22  ;;  %v633_v31 = vrot.slane %v494_v25, %v511_v30  ;;  %v640_v34 = vrot.slane %v494_v25, %v518_v33 }
 0x184   : > { %v505_v26 = vrot.slane %v475_v24, %v504_v21  ;;  %v498_v27 = vrot.slane %v475_v24, %v497_v22  ;;  %v512_v32 = vrot.slane %v475_v24, %v511_v30  ;;  %v519_v35 = vrot.slane %v475_v24, %v518_v33 }
 0x185   : > { %v647_v37 = vrot.slane %v494_v25, %v525_v36  ;;  %v526_v38 = vrot.slane %v475_v24, %v525_v36  ;;  %v654_v40 = vrot.slane %v494_v25, %v532_v39  ;;  %v533_v41 = vrot.slane %v475_v24, %v532_v39 }
 0x186   : > { %507 = vbcast.lane.b32.xlu1 %v505_v26, 256  ;;  %500 = vbcast.lane.b32.xlu0 %v498_v27, 256  ;;  %v661_v43 = vrot.slane %v494_v25, %v539_v42  ;;  %v540_v44 = vrot.slane %v475_v24, %v539_v42  ;;  %v668_v46 = vrot.slane %v494_v25, %v546_v45  ;;  %v1436_v25 = vunpack.c.l.bf16 %v1443_v18 }
 0x187   : > { %v547_v47 = vrot.slane %v475_v24, %v546_v45 }
 0x18a   : > { %628 = vbcast.lane.b32.xlu0 %v626_v28, 256  ;;  %621 = vbcast.lane.b32.xlu1 %v619_v29, 256 }
 0x18e   : > { %635 = vbcast.lane.b32.xlu0 %v633_v31, 256  ;;  %514 = vbcast.lane.b32.xlu1 %v512_v32, 256 }
 0x192   : > { %642 = vbcast.lane.b32.xlu0 %v640_v34, 256  ;;  %521 = vbcast.lane.b32.xlu1 %v519_v35, 256 }
 0x196   : > { %649 = vbcast.lane.b32.xlu0 %v647_v37, 256  ;;  %528 = vbcast.lane.b32.xlu1 %v526_v38, 256 }
 0x19a   : > { %656 = vbcast.lane.b32.xlu0 %v654_v40, 256  ;;  %535 = vbcast.lane.b32.xlu1 %v533_v41, 256 }
 0x19e   : > { %663 = vbcast.lane.b32.xlu0 %v661_v43, 256  ;;  %542 = vbcast.lane.b32.xlu1 %v540_v44, 256 }
 0x1a2   : > { %670 = vbcast.lane.b32.xlu0 %v668_v46, 256  ;;  %549 = vbcast.lane.b32.xlu1 %v547_v47, 256  ;;  %v1437_v46 = vunpack.c.h.bf16 %v1443_v18 }
 0x1f8   : > { %v508_v55 = vpop.permute.xlu1 %507  ;;  %v501_v56 = vpop.permute.xlu0 %500 }
 0x1f9   : > { %v552_v57 = vmul.f32 %v1429_v53, %v508_v55  ;;  %v551_v58 = vmul.f32 %v1428_v54, %v501_v56  ;;  %v1444_v55 = vld [vmem:[%s1991_s25 + $0x18] sm:$0xff]   ;;  %s419_s25 = scalar_lea.vmem [#allocation8], %s1987_s5 }
 0x1fa   : > { %s1235_s15 = sshll.u32 %s419_s25, 4  ;;  %s2126_s15 = int_to_ptr.vmem [resolvable:$true] %s1235_s15 }
 0x1fb   : > { %v567_v60 = vsel %vm559_vm8, %v552_v57, 0.0  ;;  %v560_v61 = vsel %vm559_vm8, %v551_v58, 0.0  ;;  %s1697_s4 = scalar_lea.vmem %s2126_s15, 16  ;;  %p1704_p12 = scmp.lt.s32.totalorder %s2126_s15, %s1702_s23 }
 0x1fc   : > { %v568_v62 = vrot.slane %v567_v60, 4  ;;  %v561_v63 = vrot.slane %v560_v61, 4  ;;  %v622_v0 = vpop.permute.xlu1 %621  ;;  %v629_v1 = vpop.permute.xlu0 %628  ;;  %p1698_p10 = scmp.ne.s32.totalorder %s2126_s15, %s1697_s4  ;;  %p1705_p7 = scmp.lt.s32.totalorder %s1703_s27, %s1697_s4 }
 0x1fd   : > { %v672_v2 = vmul.f32 %v1428_v54, %v622_v0  ;;  %v673_v3 = vmul.f32 %v1429_v53, %v629_v1 }
 0x1fe   : > { %v569_v6 = vadd.f32 %v568_v62, %v567_v60  ;;  %v562_v7 = vadd.f32 %v561_v63, %v560_v61  ;;  %p1699_p2 = pnand %p1698_p10, %p2222_p1  ;;  %p1706_p9 = por %p1705_p7, %p1704_p12 }
 0x1ff   : > { %v680_v8 = vsel %vm559_vm8, %v672_v2, 0.0  ;;  %v687_v9 = vsel %vm559_vm8, %v673_v3, 0.0  ;;  %v1440_v2 = vunpack.c.l.bf16 %v1444_v55 }
 0x200   : > { %v570_v10 = vrot.slane %v569_v6, 2  ;;  %v681_v11 = vrot.slane %v680_v8, 4  ;;  %v688_v12 = vrot.slane %v687_v9, 4  ;;  %v515_v13 = vpop.permute.xlu1 %514  ;;  %v636_v14 = vpop.permute.xlu0 %635  ;;  %v563_v15 = vrot.slane %v562_v7, 2  ;;  %p1700_p6 = pneg %p1699_p2 }
 0x201   : > { %v553_v16 = vmul.f32 %v1432_v5, %v515_v13  ;;  %v674_v20 = vmul.f32 %v1432_v5, %v636_v14  ;;  %v1441_v13 = vunpack.c.h.bf16 %v1444_v55 }
 0x202   : > { %v682_v19 = vadd.f32 %v681_v11, %v680_v8  ;;  %v689_v21 = vadd.f32 %v688_v12, %v687_v9  ;;  %v571_v22 = vadd.f32 %v570_v10, %v569_v6  ;;  %v564_v26 = vadd.f32 %v563_v15, %v562_v7  ;;  %p1707_p13 = pnand %p1706_p9, %p1700_p6 }
 0x203   : > { %v574_v27 = vsel %vm559_vm8, %v553_v16, 0.0  ;;  %v694_v31 = vsel %vm559_vm8, %v674_v20, 0.0 }
 0x204   : > { %v522_v23 = vpop.permute.xlu1 %521  ;;  %v643_v24 = vpop.permute.xlu0 %642  ;;  %v683_v30 = vrot.slane %v682_v19, 2  ;;  %v690_v32 = vrot.slane %v689_v21, 2  ;;  %v572_v35 = vrot.slane %v571_v22, 1  ;;  %v575_v36 = vrot.slane %v574_v27, 4 }
 0x205   : > { %v554_v28 = vmul.f32 %v1433_v17, %v522_v23  ;;  %v675_v29 = vmul.f32 %v1433_v17, %v643_v24  ;;  %v565_v39 = vrot.slane %v564_v26, 1  ;;  %v695_v40 = vrot.slane %v694_v31, 4 }
 0x206   : > { %v684_v43 = vadd.f32 %v683_v30, %v682_v19  ;;  %v691_v47 = vadd.f32 %v690_v32, %v689_v21  ;;  %v573_v49 = vadd.f32 %v572_v35, %v571_v22  ;;  %v576_v50 = vadd.f32 %v575_v36, %v574_v27 }
 0x207   : > { %v581_v33 = vsel %vm559_vm8, %v554_v28, 0.0  ;;  %v701_v34 = vsel %vm559_vm8, %v675_v29, 0.0  ;;  %v566_v56 = vadd.f32 %v565_v39, %v564_v26  ;;  %v696_v57 = vadd.f32 %v695_v40, %v694_v31 }
 0x208   : > { %v529_v37 = vpop.permute.xlu1 %528  ;;  %v650_v38 = vpop.permute.xlu0 %649  ;;  %v582_v41 = vrot.slane %v581_v33, 4  ;;  %v702_v44 = vrot.slane %v701_v34, 4  ;;  %v685_v60 = vrot.slane %v684_v43, 1  ;;  %v692_v0 = vrot.slane %v691_v47, 1 }
 0x209   : > { %v555_v42 = vmul.f32 %v1436_v25, %v529_v37  ;;  %v676_v45 = vmul.f32 %v1436_v25, %v650_v38  ;;  %v577_v3 = vrot.slane %v576_v50, 2  ;;  %v2057_v10 = vsel %vm753_vm9, %v573_v49, %v566_v56 }
 0x20a   : > { %v583_v58 = vadd.f32 %v582_v41, %v581_v33  ;;  %v703_v61 = vadd.f32 %v702_v44, %v701_v34  ;;  %v697_v11 = vrot.slane %v696_v57, 2  ;;  %v2059_v14 = vadd.f32 %v685_v60, %v684_v43 }
 0x20b   : > { %v588_v48 = vsel %vm559_vm8, %v555_v42, 0.0  ;;  %v708_v52 = vsel %vm559_vm8, %v676_v45, 0.0  ;;  %v693_v18 = vadd.f32 %v692_v0, %v691_v47  ;;  %v578_v22 = vadd.f32 %v577_v3, %v576_v50 }
 0x20c   : > { %v589_v51 = vrot.slane %v588_v48, 4  ;;  %v536_v53 = vpop.permute.xlu1 %535  ;;  %v657_v54 = vpop.permute.xlu0 %656  ;;  %v709_v59 = vrot.slane %v708_v52, 4  ;;  %v584_v12 = vrot.slane %v583_v58, 2  ;;  %v704_v15 = vrot.slane %v703_v61, 2 }
 0x20d   : > { %v556_v62 = vmul.f32 %v1437_v46, %v536_v53  ;;  %v677_v63 = vmul.f32 %v1437_v46, %v657_v54  ;;  %v698_v28 = vadd.f32 %v697_v11, %v696_v57  ;;  %v579_v40 = vrot.slane %v578_v22, 1 }
 0x20e   : > { %v590_v1 = vadd.f32 %v589_v51, %v588_v48  ;;  %v710_v5 = vadd.f32 %v709_v59, %v708_v52  ;;  %v585_v29 = vadd.f32 %v584_v12, %v583_v58  ;;  %v705_v32 = vadd.f32 %v704_v15, %v703_v61 }
 0x20f   : > { %v595_v6 = vsel %vm559_vm8, %v556_v62, 0.0  ;;  %v715_v7 = vsel %vm559_vm8, %v677_v63, 0.0  ;;  %v699_v48 = vrot.slane %v698_v28, 1  ;;  %v580_v60 = vadd.f32 %v579_v40, %v578_v22  ;;  %v927_v40 = vld [vmem:[#allocation5] sm:$0xff] }
 0x210   : > { %v543_v8 = vpop.permute.xlu1 %542  ;;  %v664_v9 = vpop.permute.xlu0 %663  ;;  %v596_v16 = vrot.slane %v595_v6, 4  ;;  %v716_v17 = vrot.slane %v715_v7, 4  ;;  %v591_v19 = vrot.slane %v590_v1, 2  ;;  %v711_v23 = vrot.slane %v710_v5, 2 }
 0x211   : > { %v557_v20 = vmul.f32 %v1440_v2, %v543_v8  ;;  %v678_v21 = vmul.f32 %v1440_v2, %v664_v9  ;;  %v586_v49 = vrot.slane %v585_v29, 1  ;;  %v706_v52 = vrot.slane %v705_v32, 1 }
 0x212   : > { %v597_v24 = vadd.f32 %v596_v16, %v595_v6  ;;  %v717_v25 = vadd.f32 %v716_v17, %v715_v7  ;;  %v592_v36 = vadd.f32 %v591_v19, %v590_v1  ;;  %v712_v41 = vadd.f32 %v711_v23, %v710_v5 }
 0x213   : > { %v602_v30 = vsel %vm559_vm8, %v557_v20, 0.0  ;;  %v722_v31 = vsel %vm559_vm8, %v678_v21, 0.0  ;;  %v700_v0 = vadd.f32 %v699_v48, %v698_v28  ;;  %v587_v1 = vadd.f32 %v586_v49, %v585_v29 }
 0x214   : > { %v550_v26 = vpop.permute.xlu1 %549  ;;  %v671_v27 = vpop.permute.xlu0 %670  ;;  %v598_v33 = vrot.slane %v597_v24, 2  ;;  %v718_v34 = vrot.slane %v717_v25, 2  ;;  %v603_v35 = vrot.slane %v602_v30, 4  ;;  %v723_v37 = vrot.slane %v722_v31, 4 }
 0x215   : > { %v558_v38 = vmul.f32 %v1441_v13, %v550_v26  ;;  %v679_v39 = vmul.f32 %v1441_v13, %v671_v27  ;;  %v593_v53 = vrot.slane %v592_v36, 1  ;;  %v713_v56 = vrot.slane %v712_v41, 1 }
 0x216   : > { %v599_v42 = vadd.f32 %v598_v33, %v597_v24  ;;  %v604_v43 = vadd.f32 %v603_v35, %v602_v30  ;;  %v719_v44 = vadd.f32 %v718_v34, %v717_v25  ;;  %v724_v45 = vadd.f32 %v723_v37, %v722_v31  ;;  %v934_v30 = vld [vmem:[#allocation7 + $0x18] sm:$0xff]  ;;  %v933_v35 = vld [vmem:[#allocation7 + $0x10] sm:$0xff]  ;;  %v932_v37 = vld [vmem:[#allocation7 + $0x8] sm:$0xff] }
 0x217   : > { %v609_v46 = vsel %vm559_vm8, %v558_v38, 0.0  ;;  %v729_v47 = vsel %vm559_vm8, %v679_v39, 0.0  ;;  %v707_v5 = vadd.f32 %v706_v52, %v705_v32  ;;  %v594_v6 = vadd.f32 %v593_v53, %v592_v36  ;;  %v930_v33 = vld [vmem:[#allocation5 + $0x18] sm:$0xff]  ;;  %v929_v36 = vld [vmem:[#allocation5 + $0x10] sm:$0xff]  ;;  %v928_v38 = vld [vmem:[#allocation5 + $0x8] sm:$0xff] }
 0x218   : > { %v605_v50 = vrot.slane %v604_v43, 2  ;;  %v610_v51 = vrot.slane %v609_v46, 4  ;;  %v725_v54 = vrot.slane %v724_v45, 2  ;;  %v730_v55 = vrot.slane %v729_v47, 4  ;;  %v931_v39 = vld [vmem:[#allocation7] sm:$0xff] }
 0x219   : > { %v600_v57 = vrot.slane %v599_v42, 1  ;;  %v720_v61 = vrot.slane %v719_v44, 1  ;;  %v847_v9 = vsel %vm753_vm9, %v693_v18, %v2059_v14  ;;  %v714_v11 = vadd.f32 %v713_v56, %v712_v41  ;;  %v1410_v41 = vld [vmem:[%s2198_s6] ss:$0 sm:$0xff] }
 0x21a   : > { %v606_v58 = vadd.f32 %v605_v50, %v604_v43  ;;  %v611_v59 = vadd.f32 %v610_v51, %v609_v46  ;;  %v726_v62 = vadd.f32 %v725_v54, %v724_v45  ;;  %v731_v63 = vadd.f32 %v730_v55, %v729_v47  ;;  %v1415_v50 = vld [vmem:[%s2198_s6 + $0x1] ss:$0 sm:$0xff] }
 0x21b   : > { %v601_v12 = vadd.f32 %v600_v57, %v599_v42  ;;  %v756_v15 = vsel %vm755_vm10, %v580_v60, %v2057_v10  ;;  %v721_v16 = vadd.f32 %v720_v61, %v719_v44  ;;  %v848_v20 = vsel %vm755_vm10, %v700_v0, %v847_v9  ;;  %v1114_v61 = vld [vmem:[%s2198_s6 + $0x5] sm:$0x1] }
 0x21c   : > { %v607_v2 = vrot.slane %v606_v58, 1  ;;  %v612_v3 = vrot.slane %v611_v59, 2  ;;  %v727_v7 = vrot.slane %v726_v62, 1  ;;  %v732_v8 = vrot.slane %v731_v63, 2 }
 0x21d   : > { %v758_v21 = vsel %vm757_vm11, %v587_v1, %v756_v15  ;;  %v849_v24 = vsel %vm757_vm11, %v707_v5, %v848_v20  ;;  %v1417_v5 = vld [vmem:[%s2198_s6 + $0x3] ss:$0 sm:$0xff] }
 0x21e   : > { %v613_v13 = vadd.f32 %v612_v3, %v611_v59  ;;  %v608_v17 = vadd.f32 %v607_v2, %v606_v58  ;;  %v733_v19 = vadd.f32 %v732_v8, %v731_v63  ;;  %v728_v22 = vadd.f32 %v727_v7, %v726_v62  ;;  %v1416_v2 = vld [vmem:[%s2198_s6 + $0x2] ss:$0 sm:$0xff]  ;;  %v1113_v8 = vld [vmem:[%s2198_s6 + $0x4] sm:$0x1] }
 0x21f   : > { %v760_v14 = vsel %vm759_vm12, %v594_v6, %v758_v21  ;;  %v850_v10 = vsel %vm759_vm12, %v714_v11, %v849_v24 }
 0x220   : > { %v614_v23 = vrot.slane %v613_v13, 1  ;;  %v734_v25 = vrot.slane %v733_v19, 1  ;;  %v762_v26 = vsel %vm761_vm13, %v601_v12, %v760_v14  ;;  %v851_v29 = vsel %vm761_vm13, %v721_v16, %v850_v10 }
 0x221   : > { %v764_v28 = vsel %vm763_vm14, %v608_v17, %v762_v26  ;;  %v852_v32 = vsel %vm763_vm14, %v728_v22, %v851_v29 }
 0x222   : > { %v615_v18 = vadd.f32 %v614_v23, %v613_v13  ;;  %v735_v27 = vadd.f32 %v734_v25, %v733_v19 }
 0x224   : > { %v766_v31 = vsel %vm765_vm15, %v615_v18, %v764_v28  ;;  %v853_v34 = vsel %vm765_vm15, %v735_v27, %v852_v32 }
 0x225   : > { %1476 = vmatmul.mubr.msk.f32.vlgmr.msra.gmra.mxu0 %vm559_vm8, %v766_v31  ;;  %1487 = vmatmul.mubr.msk.f32.vlgmr.msra.gmra.mxu1 %vm559_vm8, %v853_v34 }
 0x226   : > { %1490 = vmatpush3.msra.mxu0 %v934_v30  ;;  %1501 = vmatpush3.msra.mxu1 %v930_v33 }
 0x227   : > { %1491 = vmatprep.subr.mxu0 %v1806_v4  ;;  %1502 = vmatprep.subr.mxu1 %v1806_v4 }
 0x228   : > { %1492 = vmatpush3.msra.mxu0 %v933_v35  ;;  %1503 = vmatpush3.msra.mxu1 %v929_v36 }
 0x229   : > { %1493 = vmatprep.subr.mxu0 %v1806_v4  ;;  %1504 = vmatprep.subr.mxu1 %v1806_v4 }
 0x22a   : > { %1497 = vmatprep.mubr.msk.f32.mxu0 %vm1807_vm7, %v1806_v4  ;;  %1508 = vmatprep.mubr.msk.f32.mxu1 %vm1807_vm7, %v1806_v4 }
 0x22b   : > { %1494 = vmatpush3.msra.mxu0 %v932_v37  ;;  %1505 = vmatpush3.msra.mxu1 %v928_v38 }
 0x22c   : > { %1495 = vmatprep.subr.mxu0 %v1806_v4  ;;  %1506 = vmatprep.subr.mxu1 %v1806_v4 }
 0x22d   : > { %1496 = vmatpush3.msra.mxu0 %v931_v39  ;;  %1507 = vmatpush3.msra.mxu1 %v927_v40 }
 0x22e   : > { %1511 = vmatprep.subr.mxu0 %v1806_v4 }
 0x2e5   : > { %v835_v42 = vpop.f32.mrf.mxu0  ;;  %v922_v44 = vpop.f32.mrf.mxu1 }
 0x2e6   : > { %v836_v43 = vadd.f32 %v1410_v41, %v835_v42  ;;  %v923_v45 = vadd.f32 %v1410_v41, %v922_v44 }
 0x2e7   : > { %v1477_v46 = vpop.f32.mrf.mxu0  ;;  %v1488_v47 = vpop.f32.mrf.mxu1 }
 0x2e8   : > { %1509 = vmatmul.mubr.msk.f32.vlgmr.msra.gmra.mxu1 %vm559_vm8, %v836_v43  ;;  %1498 = vmatmul.mubr.msk.f32.vlgmr.msra.gmra.mxu0 %vm559_vm8, %v923_v45 }
 0x2e9   : > { %1513 = vmatprep.mubr.msk.f32.mxu0 %vm1807_vm7, %v1806_v4 }
 0x3a8   : > { %v1077_v48 = vpop.f32.mrf.mxu1  ;;  %v1004_v49 = vpop.f32.mrf.mxu0 }
 0x3a9   : > { %v1078_v51 = vadd.f32 %v1077_v48, %v1004_v49 }
 0x3aa   : > { %v1510_v52 = vpop.f32.mrf.mxu1  ;;  %v1499_v53 = vpop.f32.mrf.mxu0 }
 0x3ab   : > { %v1085_v54 = vadd.f32 %v1415_v50, %v1078_v51 }
 0x3ad   : > { %1605 = vtanh.f32 %v1085_v54 }
 0x3ba   : > { %v1606_v55 = vpop.eup %1605 }
 0x3bb   : > { %v1089_v56 = vsel %vm559_vm8, %v1606_v55, 0.0 }
 0x3bc   : > { %1090 = vadd.xlane.f32.xlu1 %v1089_v56 }
 0x445   : > { %v1091_v57 = vpop.xlane.xlu1 %1090 }
 0x446   : > { %v1093_v58 = vmul.f32 0.03125, %v1091_v57 }
 0x448   : > { %v1094_v59 = vsub.f32 %v1606_v55, %v1093_v58 }
 0x44a   : > { %v1095_v60 = vmul.f32 %v1094_v59, %v1094_v59 }
 0x44c   : > { %v1096_v4 = vsel %vm559_vm8, %v1095_v60, 0.0 }
 0x44d   : > { %1097 = vadd.xlane.f32.xlu0 %v1096_v4 }
 0x463   : > { %1117 = vperm.xlu0 %1600, %v1114_v61  }
 0x4d6   : > { %v1098_v62 = vpop.xlane.xlu0 %1097 }
 0x4d7   : > { %v1099_v63 = vmul.f32 0.03125, %v1098_v62 }
 0x4d9   : > { %v1100_v0 = vadd.f32 1e-05, %v1099_v63 }
 0x4db   : > { %1607 = vrsqrt.f32 %v1100_v0 }
 0x4de   : > { %v1118_v9 = vpop.permute.xlu0 %1117 }
 0x4e8   : > { %v1608_v1 = vpop.eup %1607 }
 0x4e9   : > { %v1102_v3 = vmul.f32 %v1608_v1, %v1094_v59 }
 0x4eb   : > { %v1107_v6 = vmul.f32 %v1416_v2, %v1102_v3 }
 0x4ed   : > { %v1112_v7 = vadd.f32 %v1417_v5, %v1107_v6 }
 0x4ef   : > { %1512 = vmatpush3.xpose.msk.msra.mxu0 %vm559_vm8, %v1112_v7 }
 0x4f2   : > { %1514 = vmatmul.mubr.msk.f32.vlgmr.msra.gmra.mxu0 %vm559_vm8, %v1113_v8 }
 0x5b2   : > { %v1192_v11 = vpop.f32.mrf.mxu0 }
 0x5b3   : > { %v1193_v12 = vadd.f32 %v1192_v11, %v1118_v9 }
 0x5b4   : > { %v1515_v13 = vpop.f32.mrf.mxu0 }
 0x5b5   : > { %v1420_v15 = vmul.f32 -1.442695, %v1193_v12 }
 0x5b7   : > { %1609 = vpow2.f32 %v1420_v15 }
 0x5c4   : > { %v1610_v16 = vpop.eup %1609 }
 0x5c5   : > { %v1199_v17 = vadd.f32 1.0, %v1610_v16 }
 0x5c7   : > { %1611 = vrcp.f32 %v1199_v17 }
 0x5d4   : > { %v1612_v19 = vpop.eup %1611 }
 0x5d5   : > { %v1203_v20 = vmax.f32 %v1612_v19, 1e-07  ;;  %1216 = vst.msk [vmem:[%s419_s25] sm:$0x1] %vm1215_vm0, %v1612_v19 }
 0x5d6   : > { %1710 = shalt.err (!%p1707_p13)
}
 0x5d7   : > { %s1711_s28 = scalar_lea.hbm %s2124_s26, 16  ;;  %s1715_s19 = scalar_lea.hbm %s2200_s8, 32 }
 0x5d8   : > { %p1712_p5 = scmp.ne.s32.totalorder %s2124_s26, %s1711_s28  ;;  %p1716_p8 = scmp.lt.s32.totalorder %s2124_s26, %s2200_s8 }
 0x5d9   : > { %p1717_p3 = scmp.lt.s32.totalorder %s1715_s19, %s1711_s28 }
 0x5da   : > { %p1713_p0 = pnand %p1712_p5, %p2222_p1 }
 0x5db   : > { %p1718_p11 = por %p1717_p3, %p1716_p8 }
 0x5dc   : > { %p1714_p4 = pneg %p1713_p0 }
 0x5de   : > { %p1719_p10 = pnand %p1718_p11, %p1714_p4 }
 0x5e0   : > { %1722 = shalt.err (!%p1719_p10)
}
 0x5e1   : > { %1526 = dma.vmem_to_hbm [thread:$0]  (%p2222_p1), %s2126_s15, 16, %s2124_s26, %s1219_s22   ;;  %v1204_v21 = vmin.f32 %v1203_v20, 0.9999999 }
 0x5e2   : > { %s437_s27 = scalar_lea.vmem %s2199_s7, %s2003_s17  ;;  %s425_s15 = scalar_lea.vmem [#allocation9], %s1987_s5 }
 0x5e3   : > { %v1209_v22 = vsub.f32 1.0, %v1204_v21  ;;  %1613 = vlog2.f32 %v1204_v21  ;;  %v1202_v23 = vld [vmem:[%s437_s27] sm:$0x1]  ;;  %s1248_s26 = sshll.u32 %s425_s15, 4  ;;  %s1246_s14 = scalar_lea.hbm %s2201_s9, %s1421_s20  ;;  %s1249_s26 = int_to_ptr.vmem [resolvable:$true] %s1248_s26 }
 0x5e4   : > { %v1208_v25 = vsub.f32 1.0, %v1202_v23  ;;  %s1223_s17 = scalar_lea.sflag [#allocation10], %s1987_s5  ;;  %s1723_s25 = scalar_lea.vmem %s1249_s26, 16 }
 0x5e5   : > { %1615 = vlog2.f32 %v1209_v22  ;;  %p1724_p2 = scmp.ne.s32.totalorder %s1249_s26, %s1723_s25  ;;  %s1809_s19 = smov [#allocation9]  }
 0x5e6   : > { %s1727_s29 = sshll.u32 %s1809_s19, 4  ;;  %s1728_s29 = int_to_ptr.vmem [resolvable:$false] %s1727_s29 }
 0x5e7   : > { %p1725_p6 = pnand %p1724_p2, %p2222_p1  ;;  %s1729_s24 = scalar_lea.vmem %s1728_s29, 32 }
 0x5e8   : > { %p1730_p7 = scmp.lt.s32.totalorder %s1249_s26, %s1728_s29  ;;  %p1731_p9 = scmp.lt.s32.totalorder %s1729_s24, %s1723_s25 }
 0x5e9   : > { %p1726_p12 = pneg %p1725_p6 }
 0x5ea   : > { %p1732_p13 = por %p1731_p9, %p1730_p7 }
 0x5ec   : > { %p1733_p5 = pnand %p1732_p13, %p1726_p12 }
 0x5f0   : > { %v1614_v24 = vpop.eup %1613 }
 0x5f1   : > { %v1206_v14 = vmul.f32 0.6931472, %v1614_v24 }
 0x5f2   : > { %v1616_v18 = vpop.eup %1615 }
 0x5f3   : > { %v1211_v26 = vmul.f32 0.6931472, %v1616_v18  ;;  %v1207_v10 = vmul.f32 %v1206_v14, %v1202_v23 }
 0x5f5   : > { %v1212_v27 = vmul.f32 %v1211_v26, %v1208_v25 }
 0x5f7   : > { %v1213_v28 = vadd.f32 %v1212_v27, %v1207_v10 }
 0x5f9   : > { %v1214_v29 = vsub.f32 0.0, %v1213_v28 }
 0x5fb   : > { %1217 = vst.msk [vmem:[%s425_s15] sm:$0x1] %vm1215_vm0, %v1214_v29 }
 0x5fc   : > { %1736 = shalt.err (!%p1733_p5)
}
 0x5fd   : > { %s1737_s13 = scalar_lea.hbm %s1246_s14, 16  ;;  %s1741_s4 = scalar_lea.hbm %s2201_s9, 32 }
 0x5fe   : > { %p1738_p0 = scmp.ne.s32.totalorder %s1246_s14, %s1737_s13  ;;  %p1742_p3 = scmp.lt.s32.totalorder %s1246_s14, %s2201_s9 }
 0x5ff   : > { %p1743_p11 = scmp.lt.s32.totalorder %s1741_s4, %s1737_s13 }
 0x600   : > { %p1739_p4 = pnand %p1738_p0, %p2222_p1 }
 0x601   : > { %p1744_p10 = por %p1743_p11, %p1742_p3 }
 0x602   : > { %p1740_p8 = pneg %p1739_p4 }
 0x604   : > { %p1745_p2 = pnand %p1744_p10, %p1740_p8 }
 0x606   : > { %1748 = shalt.err (!%p1745_p2)
}
 0x607   : > { %1527 = dma.vmem_to_hbm [thread:$0]  (%p2222_p1), %s1249_s26, 16, %s1246_s14, %s1223_s17  }
 0x608 PF: > { %s1260_s15 = sand.u32 1, %s1783_s30   ;;  %p2223_p6 = scmp.ne.s32.totalorder %s2209_s16, 0 }
 0x609   : > { %p2224_p12 = scmp.ge.s32.totalorder %s1795_s12, 2  ;;  %s1261_s22 = scalar_lea.sflag [#allocation4], %s1260_s15 }
 0x60b   : > { %p1542_p7 = pnand %p2224_p12, %p2223_p6 }
 0x60d   : > { %p1543_p9 = pneg %p1542_p7 }
 0x60f   : > { %1774 = dma.done.wait (%p1543_p9), %s1261_s22, 16  }
 0x610   : > { %1776 = vsyncadd (%p1543_p9), %s1261_s22, 4294967280  ;;  %s1269_s28 = scalar_lea.sflag [#allocation10], %s1260_s15 }
 0x611   : > { %1778 = dma.done.wait (%p1543_p9), %s1269_s28, 16  }
 0x612   : > { %1780 = vsyncadd (%p1543_p9), %s1269_s28, 4294967280  ;;  %s2225_s21 = sld [smem:[#allocation15_spill]]  ;;  %p27_p1 = scmp.ge.s32.totalorder %s1932_s18, 4  }
 0x613   : > { %s2226_s30 = smov %s1787_s10  ;;  %s2227_s10 = smov %s1791_s11 }
 0x614   : > { %s2229_s12 = smov %s1932_s18  ;;  %29 = sbr.rel (!%p27_p1) target bundleno = 11 (0xb), region = 131 }
 0x618   : > { %s2228_s11 = smov %s2225_s21 }
 0x619   :  { %1273 = vsyncpa [#allocation3], 1 }
 0x61a   :  { %1275 = vsyncpa [#allocation3 + $0x1], 1 }
 0x61b   :  { %1276 = vsyncpa [#allocation6], 1 }
 0x61c   :  { %1277 = vsyncpa [#allocation4], 1 }
 0x61d   :  { %1279 = vsyncpa [#allocation4 + $0x1], 1 }
 0x61e   :  { %1280 = vsyncpa [#allocation10], 1 }
 0x61f   :  { %1282 = vsyncpa [#allocation10 + $0x1], 1 }

</bundles_post_ra>
